<compile_context>
chip_gen: v7x
topology: tpu7x:2x2x1
jax: 0.10.0
libtpu: 0.0.40
codegen_flags: <defaults>
</compile_context>

<pallas_src>
import functools

import jax
import jax.numpy as jnp
from jax import lax
from jax.experimental import pallas as pl
from jax.experimental.pallas import tpu as pltpu


# ----------------------------------------------------------------------------
# Kernels
# ----------------------------------------------------------------------------

def _glore_single_kernel(x_ref, w_state_ref, b_state_ref, w_proj_ref,
                         b_proj_ref, w_g1t_ref, b_g1_ref, w_g2_ref,
                         w_fc_ref, bn_shift_ref, out_ref, *, l_valid):
    """Whole-L-per-batch path. x_ref: (1, C, Lp) f32 block."""
    x_bf = x_ref[0].astype(jnp.bfloat16)                                   # (C, Lp)

    # conv_state / conv_proj: 1x1 convs == channel matmuls (+ bias).
    # 1/L is pre-folded into w_state / b_state on the host.
    xs = jnp.dot(w_state_ref[...], x_bf,
                 preferred_element_type=jnp.float32) + b_state_ref[...]    # (num_s, Lp)
    xp = jnp.dot(w_proj_ref[...], x_bf,
                 preferred_element_type=jnp.float32) + b_proj_ref[...]     # (num_n, Lp)

    l_pad = xp.shape[1]
    if l_valid < l_pad:  # static: zero padded lanes of xp only (keeps x_n exact)
        lane = lax.broadcasted_iota(jnp.int32, xp.shape, 1)
        xp = jnp.where(lane < l_valid, xp, 0.0)

    xs_bf = xs.astype(jnp.bfloat16)
    xp_bf = xp.astype(jnp.bfloat16)

    # Node features: contract the lane (L) axis of both operands (no xp.T temp).
    xn = lax.dot_general(xs_bf, xp_bf, (((1,), (1,)), ((), ())),
                         preferred_element_type=jnp.float32)               # (num_s, num_n)

    # --- GCN on tiny (num_s, num_n) matrices, f32 ---
    h = jnp.dot(xn, w_g1t_ref[...],
                preferred_element_type=jnp.float32) + b_g1_ref[...]
    h = jnp.maximum(h + xn, 0.0)
    g = jnp.dot(w_g2_ref[...], h, preferred_element_type=jnp.float32)      # (num_s, num_n)

    # Reassociated back-projection: (w_fc_bn @ g) @ xp  -- tiny matmul first.
    wg = jnp.dot(w_fc_ref[...], g, preferred_element_type=jnp.float32)     # (C, num_n)
    y = jnp.dot(wg.astype(jnp.bfloat16), xp_bf,
                preferred_element_type=jnp.float32)                        # (C, Lp)

    # Residual + BN shift (BN scale folded into w_fc on the host).
    out_ref[0] = x_ref[0] + y + bn_shift_ref[...]


def _glore_pass1_kernel(x_ref, w_state_ref, b_state_ref, w_proj_ref,
                        b_proj_ref, w_g1t_ref, b_g1_ref, w_g2_ref,
                        w_fc_ref, xp_out_ref, wg_out_ref, xn_acc,
                        *, l_valid, l_pad, tile_l):
    """L-tiled pass 1: accumulate x_n, emit bf16 xp tiles and w_fc_bn @ g."""
    li = pl.program_id(1)

    @pl.when(li == 0)
    def _():
        xn_acc[...] = jnp.zeros_like(xn_acc)

    x_bf = x_ref[0].astype(jnp.bfloat16)                                   # (C, TL)
    xs = jnp.dot(w_state_ref[...], x_bf,
                 preferred_element_type=jnp.float32) + b_state_ref[...]    # (num_s, TL)
    xp = jnp.dot(w_proj_ref[...], x_bf,
                 preferred_element_type=jnp.float32) + b_proj_ref[...]     # (num_n, TL)

    if l_valid < l_pad:  # static: mask padded lanes of the (runtime) last tile
        lane = lax.broadcasted_iota(jnp.int32, xp.shape, 1) + li * tile_l
        xp = jnp.where(lane < l_valid, xp, 0.0)

    xp_bf = xp.astype(jnp.bfloat16)
    xp_out_ref[0] = xp_bf                                                  # cache for pass 2

    xn_acc[...] += lax.dot_general(xs.astype(jnp.bfloat16), xp_bf,
                                   (((1,), (1,)), ((), ())),
                                   preferred_element_type=jnp.float32)

    @pl.when(li == pl.num_programs(1) - 1)
    def _():
        xn = xn_acc[...]
        h = jnp.dot(xn, w_g1t_ref[...],
                    preferred_element_type=jnp.float32) + b_g1_ref[...]
        h = jnp.maximum(h + xn, 0.0)
        g = jnp.dot(w_g2_ref[...], h, preferred_element_type=jnp.float32)
        wg_out_ref[0] = jnp.dot(w_fc_ref[...], g,
                                preferred_element_type=jnp.float32)        # (C, num_n)


def _glore_pass2_kernel(x_ref, xp_ref, wg_ref, bn_shift_ref, out_ref):
    """L-tiled pass 2: y tile + residual. Fully parallel grid (megacore)."""
    y = jnp.dot(wg_ref[0].astype(jnp.bfloat16), xp_ref[0],
                preferred_element_type=jnp.float32)                        # (C, TL)
    out_ref[0] = x_ref[0] + y + bn_shift_ref[...]


# ----------------------------------------------------------------------------
# Host wrapper
# ----------------------------------------------------------------------------

def _vmem_budget_bytes():
    cap = 64 << 20  # conservative fallback = v7x per-TensorCore VMEM
    try:
        cap = int(pltpu.get_tpu_info().vmem_capacity_bytes)
    except Exception:
        pass
    return max(min(cap - (8 << 20), int(cap * 0.875)), 24 << 20)


def _single_footprint(C, num_s, num_n, lp):
    return (4 * C * lp * 4                              # x + out blocks, double-buffered
            + C * lp * (2 + 4)                          # x_bf + y
            + (num_s + num_n) * lp * 6                  # xs/xp f32 + bf16
            + 2 * ((num_s + num_n) * C * 2 + C * num_s * 4)
            + (2 << 20))


def _tiled_footprint(C, num_s, num_n, tl):
    p1 = (2 * C * tl * 4 + 2 * num_n * tl * 2 + 2 * C * num_n * 4
          + C * tl * 2 + (num_s + num_n) * tl * 6
          + 2 * ((num_s + num_n) * C * 2 + C * num_s * 4))
    p2 = (2 * C * tl * 4 + 2 * num_n * tl * 2 + 2 * C * num_n * 4
          + 2 * C * tl * 4 + C * tl * 4 + C * num_n * 2)
    return max(p1, p2) + (2 << 20)


def glore_unit(x_nchw, params, eps=1e-5, *, tile_l=None):
    """GloRe_Unit forward. tile_l forces the L-tiled two-pass path (testing)."""
    N, C, H, W = x_nchw.shape
    L = H * W
    Lp = ((L + 127) // 128) * 128                       # lane-align the spatial axis

    x = x_nchw.reshape(N, C, L).astype(jnp.float32)
    if Lp != L:
        x = jnp.pad(x, ((0, 0), (0, 0), (0, Lp - L)))

    num_s = params["w_state"].shape[0]
    num_n = params["w_proj"].shape[0]
    inv_l = 1.0 / L

    # 1/L folded into conv_state (xs feeds only x_n); bf16 MXU operands.
    w_state = (params["w_state"] * inv_l).astype(jnp.bfloat16)             # (num_s, C)
    b_state = (params["b_state"] * inv_l).reshape(num_s, 1).astype(jnp.float32)
    w_proj = params["w_proj"].astype(jnp.bfloat16)                         # (num_n, C)
    b_proj = params["b_proj"].reshape(num_n, 1).astype(jnp.float32)
    w_g1_t = params["w_g1"].T.astype(jnp.float32)                          # (num_n, num_n)
    b_g1 = params["b_g1"].reshape(1, num_n).astype(jnp.float32)
    w_g2 = params["w_g2"].astype(jnp.float32)                              # (num_s, num_s)

    # Inference-mode BN folded: scale into the fc_2 weight, shift stays.
    bn_scale = params["bn_gamma"] / jnp.sqrt(params["bn_var"] + eps)       # (C,)
    bn_shift = params["bn_beta"] - params["bn_mean"] * bn_scale            # (C,)
    w_fc = (bn_scale[:, None] * params["w_fc"]).astype(jnp.float32)        # (C, num_s)
    bn_shift2 = bn_shift.reshape(C, 1).astype(jnp.float32)

    vmem_cap = _vmem_budget_bytes()

    # Shared flop/byte bookkeeping for CostEstimate.
    flops_big = 2 * N * Lp * (num_s * C + num_n * C + C * num_n + num_s * num_n)
    flops_small = 2 * N * (num_s * num_n * num_n + num_s * num_s * num_n
                           + C * num_s * num_n)
    weight_bytes = ((num_s + num_n) * C * 2 + C * num_s * 4
                    + (num_n * num_n + num_s * num_s) * 4
                    + (num_s + 2 * num_n + 2 * C) * 4)

    single_fp = _single_footprint(C, num_s, num_n, Lp)
    use_tiled = (tile_l is not None) or (int(1.25 * single_fp) > vmem_cap)

    if not use_tiled:
        # ------------------------- single-pass path -------------------------
        rep = lambda s: pl.BlockSpec(s, lambda b: (0,) * len(s))
        cost = pl.CostEstimate(
            flops=flops_big + flops_small, transcendentals=0,
            bytes_accessed=2 * N * C * Lp * 4 + weight_bytes)
        vmem_limit = min(max(int(1.4 * single_fp), 32 << 20), vmem_cap)

        kernel = functools.partial(_glore_single_kernel, l_valid=L)
        out = pl.pallas_call(
            kernel,
            out_shape=jax.ShapeDtypeStruct((N, C, Lp), jnp.float32),
            grid_spec=pltpu.PrefetchScalarGridSpec(
                num_scalar_prefetch=0,
                grid=(N,),
                in_specs=[
                    pl.BlockSpec((1, C, Lp), lambda b: (b, 0, 0)),     # x
                    rep((num_s, C)),                                   # w_state (bf16, /L)
                    rep((num_s, 1)),                                   # b_state (/L)
                    rep((num_n, C)),                                   # w_proj (bf16)
                    rep((num_n, 1)),                                   # b_proj
                    rep((num_n, num_n)),                               # w_g1^T
                    rep((1, num_n)),                                   # b_g1
                    rep((num_s, num_s)),                               # w_g2
                    rep((C, num_s)),                                   # bn_scale * w_fc
                    rep((C, 1)),                                       # bn_shift
                ],
                out_specs=pl.BlockSpec((1, C, Lp), lambda b: (b, 0, 0)),
            ),
            compiler_params=pltpu.CompilerParams(
                dimension_semantics=("parallel",),
                vmem_limit_bytes=vmem_limit),
            cost_estimate=cost,
        )(x, w_state, b_state, w_proj, b_proj, w_g1_t, b_g1, w_g2, w_fc,
          bn_shift2)
    else:
        # --------------------- L-tiled two-pass path (v7x) ------------------
        if tile_l is not None:
            assert tile_l % 128 == 0 and Lp % tile_l == 0
            TL = int(tile_l)
        else:
            TL = 128
            for cand in (2048, 1024, 512, 256, 128):
                if Lp % cand == 0 and _tiled_footprint(C, num_s, num_n, cand) <= vmem_cap:
                    TL = cand
                    break
        n_l = Lp // TL

        rep2 = lambda s: pl.BlockSpec(s, lambda b, l: (0,) * len(s))
        tiled_fp = _tiled_footprint(C, num_s, num_n, TL)
        vmem_limit = min(max(int(1.4 * tiled_fp), 32 << 20), vmem_cap)

        # Pass 1: stream x tiles, accumulate x_n, cache bf16 xp tiles, emit wg.
        cost1 = pl.CostEstimate(
            flops=2 * N * Lp * (num_s * C + num_n * C + num_s * num_n) + flops_small,
            transcendentals=0,
            bytes_accessed=(N * C * Lp * 4 + N * num_n * Lp * 2
                            + N * C * num_n * 4 + weight_bytes))
        p1_kernel = functools.partial(_glore_pass1_kernel, l_valid=L, l_pad=Lp,
                                      tile_l=TL)
        xp_all, wg_all = pl.pallas_call(
            p1_kernel,
            out_shape=(jax.ShapeDtypeStruct((N, num_n, Lp), jnp.bfloat16),
                       jax.ShapeDtypeStruct((N, C, num_n), jnp.float32)),
            grid_spec=pltpu.PrefetchScalarGridSpec(
                num_scalar_prefetch=0,
                grid=(N, n_l),
                in_specs=[
                    pl.BlockSpec((1, C, TL), lambda b, l: (b, 0, l)),  # x tile
                    rep2((num_s, C)), rep2((num_s, 1)),
                    rep2((num_n, C)), rep2((num_n, 1)),
                    rep2((num_n, num_n)), rep2((1, num_n)),
                    rep2((num_s, num_s)), rep2((C, num_s)),
                ],
                out_specs=[
                    pl.BlockSpec((1, num_n, TL), lambda b, l: (b, 0, l)),  # xp cache
                    pl.BlockSpec((1, C, num_n), lambda b, l: (b, 0, 0)),   # w_fc_bn @ g
                ],
                scratch_shapes=[pltpu.VMEM((num_s, num_n), jnp.float32)],
            ),
            compiler_params=pltpu.CompilerParams(
                dimension_semantics=("parallel", "arbitrary"),
                vmem_limit_bytes=vmem_limit),
            cost_estimate=cost1,
        )(x, w_state, b_state, w_proj, b_proj, w_g1_t, b_g1, w_g2, w_fc)

        # Pass 2: y tiles + residual. Both axes parallel -> megacore-friendly
        # even for N=1 on v7x.
        cost2 = pl.CostEstimate(
            flops=2 * N * Lp * C * num_n, transcendentals=0,
            bytes_accessed=(2 * N * C * Lp * 4 + N * num_n * Lp * 2
                            + N * C * num_n * 4 + C * 4))
        out = pl.pallas_call(
            _glore_pass2_kernel,
            out_shape=jax.ShapeDtypeStruct((N, C, Lp), jnp.float32),
            grid_spec=pltpu.PrefetchScalarGridSpec(
                num_scalar_prefetch=0,
                grid=(N, n_l),
                in_specs=[
                    pl.BlockSpec((1, C, TL), lambda b, l: (b, 0, l)),      # x tile
                    pl.BlockSpec((1, num_n, TL), lambda b, l: (b, 0, l)),  # xp tile
                    pl.BlockSpec((1, C, num_n), lambda b, l: (b, 0, 0)),   # wg
                    rep2((C, 1)),                                          # bn_shift
                ],
                out_specs=pl.BlockSpec((1, C, TL), lambda b, l: (b, 0, l)),
            ),
            compiler_params=pltpu.CompilerParams(
                dimension_semantics=("parallel", "parallel"),
                vmem_limit_bytes=vmem_limit),
            cost_estimate=cost2,
        )(x, xp_all, wg_all, bn_shift2)

    if Lp != L:
        out = out[:, :, :L]
    return out.reshape(N, C, H, W)


# ----------------------------------------------------------------------------
# Parameters + pure-JAX f32 reference (mirrors the PyTorch forward exactly)
# ----------------------------------------------------------------------------

def make_params(key, num_in, num_mid):
    num_s = 2 * num_mid
    num_n = num_mid
    ks = jax.random.split(key, 8)
    scale = 0.1
    return {
        "w_state": scale * jax.random.normal(ks[0], (num_s, num_in), jnp.float32),
        "b_state": scale * jax.random.normal(ks[1], (num_s,), jnp.float32),
        "w_proj":  scale * jax.random.normal(ks[2], (num_n, num_in), jnp.float32),
        "b_proj":  scale * jax.random.normal(ks[3], (num_n,), jnp.float32),
        "w_g1":    scale * jax.random.normal(ks[4], (num_n, num_n), jnp.float32),
        "b_g1":    scale * jax.random.normal(ks[5], (num_n,), jnp.float32),
        "w_g2":    scale * jax.random.normal(ks[6], (num_s, num_s), jnp.float32),
        "w_fc":    scale * jax.random.normal(ks[7], (num_in, num_s), jnp.float32),
        "bn_gamma": jnp.ones((num_in,), jnp.float32),
        "bn_beta":  jnp.zeros((num_in,), jnp.float32),
        "bn_mean":  jnp.zeros((num_in,), jnp.float32),
        "bn_var":   jnp.ones((num_in,), jnp.float32),
    }


def glore_ref(x, params, eps=1e-5):
    N, C, H, W = x.shape
    L = H * W
    xf = x.reshape(N, C, L).astype(jnp.float32)
    xs = jnp.einsum("sc,ncl->nsl", params["w_state"], xf) + params["b_state"][None, :, None]
    xp = jnp.einsum("mc,ncl->nml", params["w_proj"], xf) + params["b_proj"][None, :, None]
    xn = jnp.einsum("nsl,nml->nsm", xs, xp) * (1.0 / L)
    h = jnp.einsum("nsm,km->nsk", xn, params["w_g1"]) + params["b_g1"][None, None, :]
    h = jnp.maximum(h + xn, 0.0)
    g = jnp.einsum("st,ntm->nsm", params["w_g2"], h)
    xs2 = jnp.einsum("nsm,nml->nsl", g, xp)
    y = jnp.einsum("cs,nsl->ncl", params["w_fc"], xs2)
    bn_scale = params["bn_gamma"] / jnp.sqrt(params["bn_var"] + eps)
    bn_shift = params["bn_beta"] - params["bn_mean"] * bn_scale
    y = y * bn_scale[None, :, None] + bn_shift[None, :, None]
    return (xf + y).reshape(N, C, H, W)


if __name__ == "__main__":
    key = jax.random.PRNGKey(0)
    k_x1, k_p1, k_x2 = jax.random.split(key, 3)

    # Case 1: lane-aligned spatial (L = 256), batch = 2.
    N, C, H, W = 2, 4, 16, 16
    num_mid = 4
    x1 = jax.random.normal(k_x1, (N, C, H, W), jnp.float32)
    p1 = make_params(k_p1, C, num_mid)
    ref1 = glore_ref(x1, p1)

    out1 = glore_unit(x1, p1)                      # single-pass (whole-L) path
    jax.block_until_ready(out1)
    assert out1.shape == (N, C, H, W) and out1.dtype == jnp.float32
    assert float(jnp.max(jnp.abs(out1 - ref1))) < 3e-2

    out1t = glore_unit(x1, p1, tile_l=128)         # forced L-tiled two-pass path
    jax.block_until_ready(out1t)
    assert float(jnp.max(jnp.abs(out1t - ref1))) < 3e-2

    # Case 2: non-128-aligned spatial (L = 225 -> Lp = 256), batch = 1.
    N2, C2, H2, W2 = 1, 8, 15, 15
    x2 = jax.random.normal(k_x2, (N2, C2, H2, W2), jnp.float32)
    p2 = make_params(jax.random.fold_in(k_p1, 1), C2, num_mid)
    ref2 = glore_ref(x2, p2)

    out2 = glore_unit(x2, p2)
    jax.block_until_ready(out2)
    assert float(jnp.max(jnp.abs(out2 - ref2))) < 3e-2

    out2t = glore_unit(x2, p2, tile_l=128)
    jax.block_until_ready(out2t)
    assert float(jnp.max(jnp.abs(out2t - ref2))) < 3e-2

    print("KERNEL_OK")
</pallas_src>

<mosaic_0001>
module attributes {stable_mosaic.version = 11 : i64} {
  func.func @_glore_single_kernel(%arg0: i32, %arg1: memref<1x4x256xf32, #tpu.memory_space<vmem>>, %arg2: memref<8x4xbf16, #tpu.memory_space<vmem>>, %arg3: memref<8x1xf32, #tpu.memory_space<vmem>>, %arg4: memref<4x4xbf16, #tpu.memory_space<vmem>>, %arg5: memref<4x1xf32, #tpu.memory_space<vmem>>, %arg6: memref<4x4xf32, #tpu.memory_space<vmem>>, %arg7: memref<1x4xf32, #tpu.memory_space<vmem>>, %arg8: memref<8x8xf32, #tpu.memory_space<vmem>>, %arg9: memref<4x8xf32, #tpu.memory_space<vmem>>, %arg10: memref<4x1xf32, #tpu.memory_space<vmem>>, %arg11: memref<1x4x256xf32, #tpu.memory_space<vmem>>) attributes {dimension_semantics = [#tpu.dimension_semantics<parallel>], iteration_bounds = array<i64: 2>, scalar_prefetch = 0 : i64, scratch_operands = 0 : i64, tpu.core_type = #tpu.core_type<tc>, window_params = [{transform_indices = @transform_0, window_bounds = array<i64: 1, 4, 256>}, {pipeline_mode = #tpu.pipeline_mode<synchronous>, transform_indices = @transform_1, window_bounds = array<i64: 8, 4>}, {pipeline_mode = #tpu.pipeline_mode<synchronous>, transform_indices = @transform_2, window_bounds = array<i64: 8, 1>}, {pipeline_mode = #tpu.pipeline_mode<synchronous>, transform_indices = @transform_3, window_bounds = array<i64: 4, 4>}, {pipeline_mode = #tpu.pipeline_mode<synchronous>, transform_indices = @transform_4, window_bounds = array<i64: 4, 1>}, {pipeline_mode = #tpu.pipeline_mode<synchronous>, transform_indices = @transform_5, window_bounds = array<i64: 4, 4>}, {pipeline_mode = #tpu.pipeline_mode<synchronous>, transform_indices = @transform_6, window_bounds = array<i64: 1, 4>}, {pipeline_mode = #tpu.pipeline_mode<synchronous>, transform_indices = @transform_7, window_bounds = array<i64: 8, 8>}, {pipeline_mode = #tpu.pipeline_mode<synchronous>, transform_indices = @transform_8, window_bounds = array<i64: 4, 8>}, {pipeline_mode = #tpu.pipeline_mode<synchronous>, transform_indices = @transform_9, window_bounds = array<i64: 4, 1>}, {transform_indices = @transform_10, window_bounds = array<i64: 1, 4, 256>}]} {
    %c0 = arith.constant 0 : index
    %c0_0 = arith.constant 0 : index
    %c0_1 = arith.constant 0 : index
    %0 = vector.load %arg1[%c0, %c0_0, %c0_1] : memref<1x4x256xf32, #tpu.memory_space<vmem>>, vector<1x4x256xf32>
    %1 = vector.shape_cast %0 : vector<1x4x256xf32> to vector<4x256xf32>
    %2 = arith.truncf %1 : vector<4x256xf32> to vector<4x256xbf16>
    %c0_2 = arith.constant 0 : index
    %c0_3 = arith.constant 0 : index
    %3 = vector.load %arg2[%c0_2, %c0_3] : memref<8x4xbf16, #tpu.memory_space<vmem>>, vector<8x4xbf16>
    %cst = arith.constant dense<0.000000e+00> : vector<8x256xf32>
    %4 = tpu.matmul %3, %2, %cst {dimension_numbers = #tpu.dot_dimension_numbers<[1], [0], [0], [1], [0, 0, 1, 1], [], []>} : vector<8x4xbf16>, vector<4x256xbf16>, vector<8x256xf32> -> vector<8x256xf32>
    %c0_4 = arith.constant 0 : index
    %c0_5 = arith.constant 0 : index
    %5 = vector.load %arg3[%c0_4, %c0_5] : memref<8x1xf32, #tpu.memory_space<vmem>>, vector<8x1xf32>
    %6 = vector.broadcast %5 : vector<8x1xf32> to vector<8x256xf32>
    %7 = arith.addf %4, %6 : vector<8x256xf32>
    %c0_6 = arith.constant 0 : index
    %c0_7 = arith.constant 0 : index
    %8 = vector.load %arg4[%c0_6, %c0_7] : memref<4x4xbf16, #tpu.memory_space<vmem>>, vector<4x4xbf16>
    %cst_8 = arith.constant dense<0.000000e+00> : vector<4x256xf32>
    %9 = tpu.matmul %8, %2, %cst_8 {dimension_numbers = #tpu.dot_dimension_numbers<[1], [0], [0], [1], [0, 0, 1, 1], [], []>} : vector<4x4xbf16>, vector<4x256xbf16>, vector<4x256xf32> -> vector<4x256xf32>
    %c0_9 = arith.constant 0 : index
    %c0_10 = arith.constant 0 : index
    %10 = vector.load %arg5[%c0_9, %c0_10] : memref<4x1xf32, #tpu.memory_space<vmem>>, vector<4x1xf32>
    %11 = vector.broadcast %10 : vector<4x1xf32> to vector<4x256xf32>
    %12 = arith.addf %9, %11 : vector<4x256xf32>
    %13 = arith.truncf %7 : vector<8x256xf32> to vector<8x256xbf16>
    %14 = arith.truncf %12 : vector<4x256xf32> to vector<4x256xbf16>
    %cst_11 = arith.constant dense<0.000000e+00> : vector<8x4xf32>
    %15 = tpu.matmul %13, %14, %cst_11 {dimension_numbers = #tpu.dot_dimension_numbers<[1], [1], [0], [0], [0, 0, 1, 0], [], []>} : vector<8x256xbf16>, vector<4x256xbf16>, vector<8x4xf32> -> vector<8x4xf32>
    %c0_12 = arith.constant 0 : index
    %c0_13 = arith.constant 0 : index
    %16 = vector.load %arg6[%c0_12, %c0_13] : memref<4x4xf32, #tpu.memory_space<vmem>>, vector<4x4xf32>
    %cst_14 = arith.constant dense<0.000000e+00> : vector<8x4xf32>
    %17 = tpu.matmul %15, %16, %cst_14 {dimension_numbers = #tpu.dot_dimension_numbers<[1], [0], [0], [1], [0, 0, 1, 1], [], []>} : vector<8x4xf32>, vector<4x4xf32>, vector<8x4xf32> -> vector<8x4xf32>
    %c0_15 = arith.constant 0 : index
    %c0_16 = arith.constant 0 : index
    %18 = vector.load %arg7[%c0_15, %c0_16] : memref<1x4xf32, #tpu.memory_space<vmem>>, vector<1x4xf32>
    %19 = vector.broadcast %18 : vector<1x4xf32> to vector<8x4xf32>
    %20 = arith.addf %17, %19 : vector<8x4xf32>
    %21 = arith.addf %20, %15 : vector<8x4xf32>
    %cst_17 = arith.constant 0.000000e+00 : f32
    %22 = vector.broadcast %cst_17 : f32 to vector<8x4xf32>
    %23 = arith.maximumf %21, %22 : vector<8x4xf32>
    %c0_18 = arith.constant 0 : index
    %c0_19 = arith.constant 0 : index
    %24 = vector.load %arg8[%c0_18, %c0_19] : memref<8x8xf32, #tpu.memory_space<vmem>>, vector<8x8xf32>
    %cst_20 = arith.constant dense<0.000000e+00> : vector<8x4xf32>
    %25 = tpu.matmul %24, %23, %cst_20 {dimension_numbers = #tpu.dot_dimension_numbers<[1], [0], [0], [1], [0, 0, 1, 1], [], []>} : vector<8x8xf32>, vector<8x4xf32>, vector<8x4xf32> -> vector<8x4xf32>
    %c0_21 = arith.constant 0 : index
    %c0_22 = arith.constant 0 : index
    %26 = vector.load %arg9[%c0_21, %c0_22] : memref<4x8xf32, #tpu.memory_space<vmem>>, vector<4x8xf32>
    %cst_23 = arith.constant dense<0.000000e+00> : vector<4x4xf32>
    %27 = tpu.matmul %26, %25, %cst_23 {dimension_numbers = #tpu.dot_dimension_numbers<[1], [0], [0], [1], [0, 0, 1, 1], [], []>} : vector<4x8xf32>, vector<8x4xf32>, vector<4x4xf32> -> vector<4x4xf32>
    %28 = arith.truncf %27 : vector<4x4xf32> to vector<4x4xbf16>
    %cst_24 = arith.constant dense<0.000000e+00> : vector<4x256xf32>
    %29 = tpu.matmul %28, %14, %cst_24 {dimension_numbers = #tpu.dot_dimension_numbers<[1], [0], [0], [1], [0, 0, 1, 1], [], []>} : vector<4x4xbf16>, vector<4x256xbf16>, vector<4x256xf32> -> vector<4x256xf32>
    %c0_25 = arith.constant 0 : index
    %c0_26 = arith.constant 0 : index
    %c0_27 = arith.constant 0 : index
    %30 = vector.load %arg1[%c0_25, %c0_26, %c0_27] : memref<1x4x256xf32, #tpu.memory_space<vmem>>, vector<1x4x256xf32>
    %31 = vector.shape_cast %30 : vector<1x4x256xf32> to vector<4x256xf32>
    %32 = arith.addf %31, %29 : vector<4x256xf32>
    %c0_28 = arith.constant 0 : index
    %c0_29 = arith.constant 0 : index
    %33 = vector.load %arg10[%c0_28, %c0_29] : memref<4x1xf32, #tpu.memory_space<vmem>>, vector<4x1xf32>
    %34 = vector.broadcast %33 : vector<4x1xf32> to vector<4x256xf32>
    %35 = arith.addf %32, %34 : vector<4x256xf32>
    %c0_30 = arith.constant 0 : index
    %c0_31 = arith.constant 0 : index
    %c0_32 = arith.constant 0 : index
    %36 = vector.load %arg11[%c0_30, %c0_31, %c0_32] : memref<1x4x256xf32, #tpu.memory_space<vmem>>, vector<1x4x256xf32>
    %37 = vector.shape_cast %36 : vector<1x4x256xf32> to vector<4x256xf32>
    %38 = vector.shape_cast %35 : vector<4x256xf32> to vector<1x4x256xf32>
    tpu.vector_store %arg11[%c0_30, %c0_31, %c0_32], %38 {strides = array<i32>} : memref<1x4x256xf32, #tpu.memory_space<vmem>>, vector<1x4x256xf32>,
    return
  }
  func.func @transform_0(%arg0: i32) -> (i32, i32, i32) {
    %c0_i32 = arith.constant 0 : i32
    %c0_i32_0 = arith.constant 0 : i32
    %c0_i32_1 = arith.constant 0 : i32
    return %arg0, %c0_i32, %c0_i32_0 : i32, i32, i32
  }
  func.func @transform_1(%arg0: i32) -> (i32, i32) {
    %c0_i32 = arith.constant 0 : i32
    %c0_i32_0 = arith.constant 0 : i32
    %c0_i32_1 = arith.constant 0 : i32
    return %c0_i32, %c0_i32_0 : i32, i32
  }
  func.func @transform_2(%arg0: i32) -> (i32, i32) {
    %c0_i32 = arith.constant 0 : i32
    %c0_i32_0 = arith.constant 0 : i32
    %c0_i32_1 = arith.constant 0 : i32
    return %c0_i32, %c0_i32_0 : i32, i32
  }
  func.func @transform_3(%arg0: i32) -> (i32, i32) {
    %c0_i32 = arith.constant 0 : i32
    %c0_i32_0 = arith.constant 0 : i32
    %c0_i32_1 = arith.constant 0 : i32
    return %c0_i32, %c0_i32_0 : i32, i32
  }
  func.func @transform_4(%arg0: i32) -> (i32, i32) {
    %c0_i32 = arith.constant 0 : i32
    %c0_i32_0 = arith.constant 0 : i32
    %c0_i32_1 = arith.constant 0 : i32
    return %c0_i32, %c0_i32_0 : i32, i32
  }
  func.func @transform_5(%arg0: i32) -> (i32, i32) {
    %c0_i32 = arith.constant 0 : i32
    %c0_i32_0 = arith.constant 0 : i32
    %c0_i32_1 = arith.constant 0 : i32
    return %c0_i32, %c0_i32_0 : i32, i32
  }
  func.func @transform_6(%arg0: i32) -> (i32, i32) {
    %c0_i32 = arith.constant 0 : i32
    %c0_i32_0 = arith.constant 0 : i32
    %c0_i32_1 = arith.constant 0 : i32
    return %c0_i32, %c0_i32_0 : i32, i32
  }
  func.func @transform_7(%arg0: i32) -> (i32, i32) {
    %c0_i32 = arith.constant 0 : i32
    %c0_i32_0 = arith.constant 0 : i32
    %c0_i32_1 = arith.constant 0 : i32
    return %c0_i32, %c0_i32_0 : i32, i32
  }
  func.func @transform_8(%arg0: i32) -> (i32, i32) {
    %c0_i32 = arith.constant 0 : i32
    %c0_i32_0 = arith.constant 0 : i32
    %c0_i32_1 = arith.constant 0 : i32
    return %c0_i32, %c0_i32_0 : i32, i32
  }
  func.func @transform_9(%arg0: i32) -> (i32, i32) {
    %c0_i32 = arith.constant 0 : i32
    %c0_i32_0 = arith.constant 0 : i32
    %c0_i32_1 = arith.constant 0 : i32
    return %c0_i32, %c0_i32_0 : i32, i32
  }
  func.func @transform_10(%arg0: i32) -> (i32, i32, i32) {
    %c0_i32 = arith.constant 0 : i32
    %c0_i32_0 = arith.constant 0 : i32
    %c0_i32_1 = arith.constant 0 : i32
    return %arg0, %c0_i32, %c0_i32_0 : i32, i32, i32
  }
}

</mosaic_0001>

<bundles_post_ra>
// kernel: tpu_custom_call.1
= control target key start
LH: loop header
LB: loop body
LE: loop exit
PB: predicated region body
PF: predicated region fallthrough
CT: control target
= control target key end

     0   :  { %15 = vsyncpa [#allocation3], 0  ;;  %s1264_s0 = inlined_call_operand.vmem [shape: f32[2,4,256], index: 0, kind: input, shape index: {}]   ;;  %s1265_s1 = inlined_call_operand.vmem [shape: bf16[8,4], index: 1, kind: input, shape index: {}]   ;;  %s1266_s2 = inlined_call_operand.vmem [shape: f32[8,1], index: 2, kind: input, shape index: {}]   ;;  %s1267_s3 = inlined_call_operand.vmem [shape: bf16[4,4], index: 3, kind: input, shape index: {}]   ;;  %s1268_s4 = inlined_call_operand.vmem [shape: f32[4,1], index: 4, kind: input, shape index: {}]   ;;  %s1269_s5 = inlined_call_operand.vmem [shape: f32[4,4], index: 5, kind: input, shape index: {}]   ;;  %s1270_s6 = inlined_call_operand.vmem [shape: f32[1,4], index: 6, kind: input, shape index: {}]   ;;  %s1271_s7 = inlined_call_operand.vmem [shape: f32[8,8], index: 7, kind: input, shape index: {}]   ;;  %s1272_s8 = inlined_call_operand.vmem [shape: f32[4,8], index: 8, kind: input, shape index: {}]   ;;  %s1273_s9 = inlined_call_operand.vmem [shape: f32[4,1], index: 9, kind: input, shape index: {}]   ;;  %s1274_s10 = inlined_call_operand.hbm [shape: f32[2,4,256], index: 10, kind: output, shape index: {}]  }
   0x1   :  { %17 = vsyncpa [#allocation3 + $0x1], 0  ;;  %s1116_s13 = smov 0   ;;  %s1118_s14 = smov 0  }
   0x2   :  { %s1120_s15 = smov 0   ;;  %s1122_s16 = smov 0  }
   0x3 LB: > { %s1137_s17 = sadd.s32 4294967295, %s1054_s16   ;;  %s900_s18 = sadd.s32 4294967294, %s1054_s16   ;;  %s1054_s16 = sphi %s1122_s16, %s1280_s16   ;;  %s1050_s15 = sphi %s1120_s15, %s1279_s15   ;;  %s1046_s14 = sphi %s1118_s14, %s1278_s14   ;;  %s1042_s13 = sphi %s1116_s13, %s1277_s13  }
   0x4   : > { %s1141_s19 = sadd.s32 1, %s1054_s16   ;;  %s245_s20 = sadd.s32 1, %s1050_s15 }
   0x5   : > { %s242_s21 = ssub.s32 %s1054_s16, %s1141_s19  ;;  %p255_p0 = scmp.ne.s32.totalorder %s1050_s15, %s1046_s14 }
   0x6   : > { %p243_p1 = scmp.eq.s32.totalorder %s242_s21, 0  ;;  %p256_p2 = scmp.eq.s32.totalorder %s1137_s17, 1 }
   0x7   : > { %p261_p3 = scmp.ne.s32.totalorder %s1046_s14, %s1042_s13  ;;  %p262_p4 = scmp.eq.s32.totalorder %s900_s18, 1 }
   0x8   : > { %s1152_s22 = scalar_select %p243_p1, %s1050_s15, %s245_s20  }
   0x9   : > { %p1154_p5 = por %p256_p2, %p255_p0  ;;  %p1158_p6 = por %p262_p4, %p261_p3 }
   0xa   : > { %p903_p7 = scmp.ge.s32.totalorder %s1054_s16, 1  ;;  %p315_p8 = scmp.lt.s32.totalorder %s1054_s16, 3 }
   0xc   : > { %p316_p9 = pnand %p903_p7, %p315_p8 }
   0xd   : > { %p353_p10 = scmp.lt.s32.totalorder (!%p316_p9), %s1137_s17, 1  ;;  %v1056_v0 = vmov (!%p316_p9), 0   ;;  %v425_v1 = vld [vmem:[%s1268_s4] sm:$0xf] (!%p316_p9)  ;;  %vm376_vm0 = vcmask (!%p316_p9), 1041408   ;;  %vm372_vm1 = vcmask (!%p316_p9), 31744   ;;  %v819_v51 = vlaneseq (!%p316_p9) }
   0xe   : > { %319 = sbr.rel (%p316_p9) target bundleno = 1350 (0x546), region = 60  ;;  %415 = vmatprep.mubr.bf16.mxu0 (!%p316_p9), %v1056_v0  ;;  %466 = vmatprep.mubr.bf16.mxu1 (!%p316_p9), %v1056_v0  ;;  %v366_v2 = vld [vmem:[%s1266_s2] sm:$0xff] (!%p316_p9)  ;;  %v1057_v10 = vmov (!%p316_p9), 0.0   ;;  %vm530_vm2 = vcmask (!%p316_p9), 1043456   ;;  %vm1058_vm3 = vmmov (!%p316_p9), 0   ;;  %vm607_vm4 = vcmask (!%p316_p9), 64512  }
   0xf   : > { %989 = vset.pattern.permute.xlu0 (!%p316_p9), %v1056_v0  ;;  %990 = vset.pattern.permute.xlu1 (!%p316_p9), %v1056_v0  ;;  %v365_v8 = vld [vmem:[%s1265_s1] sm:$0xf] (!%p316_p9)  ;;  %v1059_v49 = vmov (!%p316_p9), 839922192   ;;  %v820_v53 = vshrl.u32 (!%p316_p9), %v819_v51, 7  ;;  %s350_s26 = sand.u32 (!%p316_p9), 1, %s1046_s14  }
  0x10   : > { %428 = vperm.xlu0 (!%p316_p9), %989, %v425_v1   ;;  %v424_v9 = vld [vmem:[%s1267_s3] sm:$0x3] (!%p316_p9)  ;;  %v817_v50 = vunpack.c.l.s4 (!%p316_p9), %v1059_v49  ;;  %s827_s20 = scalar_lea.sflag (!%p316_p9), [#allocation3], %s350_s26 }
  0x11   : > { %v519_v29 = vld [vmem:[%s1269_s5] sm:$0xf] (!%p316_p9) }
  0x12   : > { %v911_v34 = vld [vmem:[%s1270_s6] ss:$0 sm:$0xff] (!%p316_p9)  ;;  %v818_v52 = vunpack.c.0.s8 (!%p316_p9), %v817_v50 }
  0x13   : > { %v606_v40 = vld [vmem:[%s1271_s7] sm:$0xff] (!%p316_p9) }
  0x14   : > { %369 = vperm.xlu0 (!%p316_p9), %989, %v366_v2   ;;  %v681_v42 = vld [vmem:[%s1272_s8] sm:$0xf] (!%p316_p9)  ;;  %v821_v54 = vsub.s32 (!%p316_p9), %v818_v52, %v820_v53 }
  0x15   : > { %s354_s27 = scalar_select %p353_p10, %s1137_s17, 1  ;;  %v811_v45 = vld [vmem:[%s1273_s9] sm:$0xf] }
  0x16   : > { %814 = vperm.xlu1 %990, %v811_v45  }
  0x17   : > { %s923_s28 = sshll.u32 %s354_s27, 3  ;;  %s904_s27 = sshll.u32 %s350_s26, 3 }
  0x18   : > { %s357_s18 = scalar_lea.vmem %s1264_s0, %s923_s28  ;;  %s924_s28 = sshll.u32 %s1137_s17, 7 }
  0x19   : > { %v1179_v3 = vld [vmem:[%s357_s18] sm:$0xff]  ;;  %s352_s29 = scalar_lea.vmem [#allocation2], %s904_s27  ;;  %s1222_s18 = scalar_lea.hbm %s1274_s10, %s924_s28 }
  0x1a   : > { %v361_v4 = vcombine.high %v1179_v3, %v1179_v3  ;;  %v363_v5 = vpack.c.bf16 %v1179_v3, %v1179_v3  ;;  %s841_s30 = sshll.u32 %s352_s29, 4  ;;  %s1060_s17 = smov [#allocation2]   ;;  %s1224_s30 = int_to_ptr.vmem [resolvable:$true] %s841_s30 }
  0x1b   : > { %s992_s21 = scalar_lea.vmem %s1224_s30, 128  ;;  %s996_s25 = sshll.u32 %s1060_s17, 4  ;;  %s997_s25 = int_to_ptr.vmem [resolvable:$false] %s996_s25 }
  0x1c   : > { %v364_v6 = vpack.c.bf16 %v361_v4, %v361_v4  ;;  %v378_v7 = vsel %vm376_vm0, %v363_v5, 0  ;;  %p993_p11 = scmp.ne.s32.totalorder %s1224_s30, %s992_s21  ;;  %s998_s27 = scalar_lea.vmem %s997_s25, 256 }
  0x1d   : > { %p999_p0 = scmp.lt.s32.totalorder %s1224_s30, %s997_s25  ;;  %p1000_p1 = scmp.lt.s32.totalorder %s998_s27, %s992_s21 }
  0x1e   : > { %907 = vmatprep.subr.msk.bf16.mxu0 %vm376_vm0, %v364_v6  ;;  %909 = vmatprep.subr.msk.bf16.mxu1 %vm376_vm0, %v364_v6  ;;  %p994_p12 = pnand %p993_p11, %p1154_p5 }
  0x1f   : > { %384 = vmatpush1.bf16.msra.mxu0 %v378_v7  ;;  %435 = vmatpush1.bf16.msra.mxu1 %v378_v7  ;;  %p1001_p2 = por %p1000_p1, %p999_p0 }
  0x20   : > { %931 = vmatprep.subr.mxu1 %v1057_v10  ;;  %p995_p13 = pneg %p994_p12 }
  0x22   : > { %908 = vmatmul.mubr.msk.bf16.vlgmr.msra.gmra.mrb[0].mxu0 %vm372_vm1, %v365_v8  ;;  %910 = vmatmul.mubr.msk.bf16.vlgmr.msra.gmra.mrb[0].mxu1 %vm372_vm1, %v424_v9  ;;  %p1002_p3 = pnand %p1001_p2, %p995_p13 }
  0x23   : > { %932 = vmatpush3.msk.msra.mxu1 %vm530_vm2, %v519_v29  ;;  %933 = vmatprep.mubr.msk.f32.mxu1 %vm1058_vm3, %v1057_v10 }
  0x24   : > { %936 = vmatprep.subr.mxu1 %v1057_v10 }
  0x8f   : > { %v429_v11 = vpop.permute.xlu0 %428 }
  0x93   : > { %v370_v12 = vpop.permute.xlu0 %369 }
  0x95   : > { %v815_v55 = vpop.permute.xlu1 %814 }
  0x96   : > { %v822_v60 = vrot.slane %v815_v55, %v821_v54 }
  0xf5   : > { %v417_v13 = vpop.f32.mrb[0].mxu0  ;;  %v468_v14 = vpop.f32.mrb[0].mxu1 }
  0xf6   : > { %v469_v15 = vadd.f32 %v468_v14, %v429_v11  ;;  %v419_v16 = vpop.f32.mrb[1].mxu0  ;;  %v470_v17 = vpop.f32.mrb[1].mxu1  ;;  %v418_v27 = vadd.f32 %v417_v13, %v370_v12 }
  0xf7   : > { %v420_v18 = vadd.f32 %v419_v16, %v370_v12  ;;  %v471_v19 = vadd.f32 %v470_v17, %v429_v11  ;;  %v472_v20 = vpop.f32.mrb[2].mxu1  ;;  %v421_v21 = vpop.f32.mrb[2].mxu0 }
  0xf8   : > { %v473_v22 = vpop.f32.mrb[3].mxu1  ;;  %v422_v23 = vpop.f32.mrb[3].mxu0  ;;  %v477_v26 = vpack.c.bf16 %v469_v15, %v469_v15  ;;  %v475_v28 = vpack.c.bf16 %v418_v27, %v418_v27 }
  0xf9   : > { %v476_v24 = vpack.c.bf16 %v420_v18, %v420_v18  ;;  %v478_v25 = vpack.c.bf16 %v471_v19, %v471_v19 }
  0xfa   : > { %v760_v41 = vsel %vm376_vm0, %v477_v26, 0 }
  0xfb   : > { %479 = vmatprep.subr.bf16.mxu0 %v478_v25  ;;  %511 = vmatprep.mubr.bf16.mxu0 %v476_v24 }
  0xfc   : > { %480 = vmatpush1.bf16.xpose.msra.mxu0 %v477_v26 }
  0xfd   : > { %941 = vmatprep.subr.mxu0 %v1057_v10 }
 0x103   : > { %512 = vmatmul.mubr.bf16.vlgmr.msra.gmra.mrb[4].mxu0 %v475_v28 }
 0x104   : > { %943 = vmatprep.mubr.msk.f32.mxu0 %vm1058_vm3, %v1057_v10 }
 0x1d6   : > { %v513_v30 = vpop.f32.mrb[4].mxu0 }
 0x1d7   : > { %v515_v31 = vpop.f32.mrb[5].mxu0  ;;  %934 = vmatmul.mubr.msk.f32.vlgmr.msra.gmra.mrb[4].mxu1 %vm372_vm1, %v513_v30 }
 0x1d8   : > { %v516_v32 = vpop.f32.mrb[6].mxu0  ;;  %938 = vmatprep.mubr.msk.f32.mxu1 %vm1058_vm3, %v1057_v10 }
 0x1d9   : > { %v517_v33 = vpop.f32.mrb[7].mxu0 }
 0x2aa   : > { %v600_v35 = vpop.f32.mrb[4].mxu1 }
 0x2ab   : > { %v601_v36 = vadd.f32 %v911_v34, %v600_v35  ;;  %v935_v37 = vpop.f32.mrb[5].mxu1 }
 0x2ad   : > { %v604_v38 = vadd.f32 %v601_v36, %v513_v30 }
 0x2af   : > { %v605_v39 = vmax.f32 %v604_v38, 0.0 }
 0x2b1   : > { %937 = vmatpush3.msra.mxu1 %v605_v39 }
 0x2b2   : > { %939 = vmatmul.mubr.msk.f32.vlgmr.msra.gmra.mrb[6].mxu1 %vm607_vm4, %v606_v40  ;;  %916 = vmatprep.subr.msk.bf16.mxu1 %vm376_vm0, %v478_v25 }
 0x2b3   : > { %766 = vmatpush1.bf16.msra.mxu1 %v760_v41  ;;  %797 = vmatprep.mubr.bf16.mxu1 %v1056_v0 }
 0x385   : > { %v677_v43 = vpop.f32.mrb[6].mxu1 }
 0x386   : > { %v940_v44 = vpop.f32.mrb[7].mxu1  ;;  %942 = vmatpush3.msra.mxu0 %v677_v43 }
 0x387   : > { %944 = vmatmul.mubr.msk.f32.vlgmr.msra.gmra.mrb[8].mxu0 %vm607_vm4, %v681_v42 }
 0x45a   : > { %v751_v46 = vpop.f32.mrb[8].mxu0 }
 0x45b   : > { %v755_v47 = vpack.c.bf16 %v751_v46, %v751_v46  ;;  %v945_v48 = vpop.f32.mrb[9].mxu0 }
 0x45d   : > { %917 = vmatmul.mubr.msk.bf16.vlgmr.msra.gmra.mrb[8].mxu1 %vm372_vm1, %v755_v47 }
 0x530   : > { %v799_v56 = vpop.f32.mrb[8].mxu1 }
 0x531   : > { %v801_v57 = vpop.f32.mrb[9].mxu1 }
 0x532   : > { %v808_v58 = vcombine.low %v799_v56, %v801_v57  ;;  %v803_v59 = vpop.f32.mrb[10].mxu1 }
 0x533   : > { %v804_v61 = vpop.f32.mrb[11].mxu1 }
 0x534   : > { %v810_v62 = vadd.f32 %v808_v58, %v1179_v3 }
 0x536   : > { %v824_v63 = vadd.f32 %v822_v60, %v810_v62 }
 0x538   : > { %825 = vst [vmem:[%s352_s29] sm:$0xff] %v824_v63 }
 0x539   : > { %1005 = shalt.err (!%p1002_p3)
}
 0x53a   : > { %s1006_s26 = scalar_lea.hbm %s1222_s18, 128  ;;  %s1010_s11 = scalar_lea.hbm %s1274_s10, 256 }
 0x53b   : > { %p1007_p4 = scmp.ne.s32.totalorder %s1222_s18, %s1006_s26  ;;  %p1011_p9 = scmp.lt.u32.totalorder %s1222_s18, %s1274_s10 }
 0x53c   : > { %p1012_p10 = scmp.lt.u32.totalorder %s1010_s11, %s1006_s26  ;;  %p1014_p12 = scmp.lt.u32.totalorder %s1006_s26, %s1222_s18 }
 0x53d   : > { %p1008_p7 = pnand %p1007_p4, %p1154_p5 }
 0x53e   : > { %p1013_p11 = por %p1012_p10, %p1011_p9 }
 0x53f   : > { %p1009_p8 = pneg %p1008_p7 }
 0x540   : > { %p1015_p13 = por %p1014_p12, %p1013_p11 }
 0x542   : > { %p1016_p0 = pnand %p1015_p13, %p1009_p8 }
 0x544   : > { %1019 = shalt.err (!%p1016_p0)
}
 0x545   : > { %946 = dma.vmem_to_hbm [thread:$0]  (%p1154_p5), %s1224_s30, 128, %s1222_s18, %s827_s20  }
 0x546 PF: > { %p952_p1 = scmp.ge.s32.totalorder %s1054_s16, 2  ;;  %s853_s21 = sand.u32 1, %s1042_s13  }
 0x547   : > { %s854_s25 = scalar_lea.sflag [#allocation3], %s853_s21 }
 0x548   : > { %p949_p2 = pnand %p952_p1, %p1158_p6 }
 0x54a   : > { %1037 = dma.done.wait (!%p949_p2), %s854_s25, 128  }
 0x54b   : > { %1039 = vsyncadd (!%p949_p2), %s854_s25, 4294967168  ;;  %p20_p3 = scmp.ge.s32.totalorder %s1141_s19, 4   ;;  %s1277_s13 = smov %s1046_s14 }
 0x54c   : > { %s1278_s14 = smov %s1050_s15  ;;  %s1279_s15 = smov %s1152_s22 }
 0x54d   : > { %s1280_s16 = smov %s1141_s19  ;;  %22 = sbr.rel (!%p20_p3) target bundleno = 3 (0x3), region = 95 }
 0x554   :  { %859 = vsyncpa [#allocation3], 1 }
 0x555   :  { %861 = vsyncpa [#allocation3 + $0x1], 1 }

</bundles_post_ra>
